<compile_context>
chip_gen: v5e
topology: v5e:2x2
jax: 0.10.0
libtpu: 0.0.40
codegen_flags: <defaults>
</compile_context>

<pallas_src>
import functools

import jax
import jax.numpy as jnp
from jax.experimental import pallas as pl
from jax.experimental.pallas import tpu as pltpu

_HIDDEN = (256, 128, 64, 32)
_EPS = 1e-5


def _mlp_kernel(x_ref,
                w1, g1, be1,
                w2, g2, be2,
                w3, g3, be3,
                w4, g4, be4,
                w5, b5,
                o_ref):
    """Fused dense hot path: 5 MXU matmuls (bf16 operands, f32 accumulate),
    4 training-mode BatchNorms folded to scale/shift, 4 SiLUs."""
    inv_n = 1.0 / x_ref.shape[0]          # static whole-batch size

    def matmul(h_bf16, w_ref):
        # bf16 operands -> full-rate MXU; accumulation stays f32.
        return jnp.dot(h_bf16, w_ref[...], preferred_element_type=jnp.float32)

    def bn_silu(h, g_ref, be_ref):
        # Single-pass full-batch stats (biased variance, PyTorch training mode).
        # TODO(synk): if a bundle dump shows VALU/XLU saturating, move these
        # axis-0 reductions onto the (mostly idle) MXU via
        # jnp.dot(ones((1, B)), h) — verify with a bundle count first.
        s1 = jnp.sum(h, axis=0, keepdims=True)
        s2 = jnp.sum(h * h, axis=0, keepdims=True)
        mean = s1 * inv_n
        var = jnp.maximum(s2 * inv_n - mean * mean, 0.0)
        # Fold BN into a per-feature scale/shift: 2 VALU ops per element.
        scale = jax.lax.rsqrt(var + _EPS) * g_ref[...]
        shift = be_ref[...] - mean * scale
        h_bn = h * scale + shift
        # sigmoid -> EUP transcendental slot; VALU only pays one multiply.
        return h_bn * jax.nn.sigmoid(h_bn)

    # Linear biases of layers 1-4 are dropped in the wrapper: they are exactly
    # cancelled by the immediately-following BatchNorm mean subtraction.
    h = bn_silu(matmul(x_ref[...], w1), g1, be1)                    # (B, 256)
    h = bn_silu(matmul(h.astype(jnp.bfloat16), w2), g2, be2)        # (B, 128)
    h = bn_silu(matmul(h.astype(jnp.bfloat16), w3), g3, be3)        # (B, 64)
    h = bn_silu(matmul(h.astype(jnp.bfloat16), w4), g4, be4)        # (B, 32)
    # Lane-dense (multiple-of-128) unmasked store; wrapper slices num_classes.
    o_ref[...] = matmul(h.astype(jnp.bfloat16), w5) + b5[...]


def init_params(key, num_cont_features, cat_dims, embed_dims, num_classes):
    """Deterministic synthetic parameters matching TorchMLP.__init__ shapes.

    Linear weights are stored transposed vs PyTorch, i.e. (in, out), so the
    kernel computes y = x @ W + b (== x @ W_pt.T + b_pt).
    """
    dims_in = [num_cont_features + sum(embed_dims)] + list(_HIDDEN)
    dims_out = list(_HIDDEN) + [num_classes]
    params = {"emb": [], "lin": [], "bn": []}
    keys = jax.random.split(key, len(cat_dims) + len(dims_in))
    for i, (cd, ed) in enumerate(zip(cat_dims, embed_dims)):
        params["emb"].append(jax.random.normal(keys[i], (cd, ed), jnp.float32))
    for j, (din, dout) in enumerate(zip(dims_in, dims_out)):
        k = keys[len(cat_dims) + j]
        kw, kb = jax.random.split(k)
        scale = 1.0 / jnp.sqrt(jnp.float32(din))
        w = jax.random.uniform(kw, (din, dout), jnp.float32, -scale, scale)
        b = jax.random.uniform(kb, (1, dout), jnp.float32, -scale, scale)
        params["lin"].append((w, b))
    for dout in dims_out[:-1]:
        params["bn"].append((jnp.ones((1, dout), jnp.float32),
                             jnp.zeros((1, dout), jnp.float32)))
    return params


def prepare_kernel_params(params, num_classes):
    """One-time prep (outside jit): cast weights to bf16 once, zero-pad the last
    Linear to a multiple of 128 output lanes, drop layer 1-4 biases (cancelled
    exactly by BN mean subtraction)."""
    out_pad = 128 * ((num_classes + 127) // 128)
    pad = out_pad - num_classes
    kp = []
    for i in range(4):
        w, _b = params["lin"][i]                 # bias folded away by BN
        g, be = params["bn"][i]
        kp += [w.astype(jnp.bfloat16), g, be]
    w5, b5 = params["lin"][4]
    kp += [jnp.pad(w5, ((0, 0), (0, pad))).astype(jnp.bfloat16),
           jnp.pad(b5, ((0, 0), (0, pad)))]
    return tuple(kp)


@functools.partial(jax.jit, static_argnames=("num_classes",))
def torch_mlp_forward(x_cont, x_cat, emb_tables, kparams, *, num_classes):
    # Embedding gathers + concat stay in XLA (data-dependent gather); the dense
    # chain runs inside one fused Pallas kernel (no HBM round-trips).
    embeds = [tbl[x_cat[:, i]] for i, tbl in enumerate(emb_tables)]
    x = jnp.concatenate([x_cont] + embeds, axis=1)
    B, d_in = x.shape
    x = x.astype(jnp.bfloat16)                   # matmul-operand dtype

    out_pad = 128 * ((num_classes + 127) // 128)
    flat_args = (x,) + tuple(kparams)

    # Advisory cost hint for XLA's scheduler.
    dims = [d_in] + list(_HIDDEN) + [out_pad]
    flops = 2 * B * sum(a * b for a, b in zip(dims[:-1], dims[1:]))
    transcendentals = B * sum(_HIDDEN) + sum(_HIDDEN)     # sigmoids + rsqrts
    io_bytes = sum(a.size * a.dtype.itemsize for a in flat_args) + B * out_pad * 4
    cost = pl.CostEstimate(flops=flops, transcendentals=transcendentals,
                           bytes_accessed=io_bytes)

    # Generation-aware VMEM budget.  Training-mode BN forces whole-batch
    # residency; peak live footprint is at layer 1 (input + pre-act + h*h temp
    # + post-SiLU activation, all at width 256).
    peak_act_bytes = B * (2 * d_in + 4 * 4 * max(_HIDDEN))
    vmem_needed = io_bytes + peak_act_bytes
    try:
        phys_vmem = int(pltpu.get_tpu_info().vmem_capacity_bytes)
    except Exception:
        phys_vmem = 64 * 1024 * 1024             # conservative (v7x-sized) fallback
    cap = (3 * phys_vmem) // 4                   # ~48 MiB v7x, ~96 MiB v5e/v6e
    vmem_limit = int(min(max(2 * vmem_needed, 32 * 1024 * 1024), cap))

    vmem_spec = pl.BlockSpec(memory_space=pltpu.MemorySpace.VMEM)
    out = pl.pallas_call(
        _mlp_kernel,
        out_shape=jax.ShapeDtypeStruct((B, out_pad), jnp.float32),
        in_specs=[vmem_spec] * len(flat_args),
        out_specs=vmem_spec,
        compiler_params=pltpu.CompilerParams(vmem_limit_bytes=vmem_limit),
        cost_estimate=cost,
    )(*flat_args)
    return out[:, :num_classes]


def reference_forward_f32(x_cont, x_cat, params):
    """Pure-JAX f32 reference, faithful to PyTorch training-mode BN
    (Dropout as identity / eval semantics)."""
    embeds = [tbl[x_cat[:, i]] for i, tbl in enumerate(params["emb"])]
    h = jnp.concatenate([x_cont] + embeds, axis=1)
    for i in range(4):
        w, b = params["lin"][i]
        g, be = params["bn"][i]
        h = h @ w + b
        mean = jnp.mean(h, axis=0, keepdims=True)
        var = jnp.mean((h - mean) ** 2, axis=0, keepdims=True)
        h = (h - mean) / jnp.sqrt(var + _EPS) * g + be
        h = h * jax.nn.sigmoid(h)
    w5, b5 = params["lin"][4]
    return h @ w5 + b5


def reference_forward_bf16(x_cont, x_cat, params):
    """Same math with bf16 matmul operands / f32 accumulation, matching the
    kernel's MXU precision (tight correctness gate)."""
    embeds = [tbl[x_cat[:, i]] for i, tbl in enumerate(params["emb"])]
    h = jnp.concatenate([x_cont] + embeds, axis=1)
    for i in range(4):
        w, b = params["lin"][i]
        g, be = params["bn"][i]
        h = jnp.dot(h.astype(jnp.bfloat16), w.astype(jnp.bfloat16),
                    preferred_element_type=jnp.float32) + b
        mean = jnp.mean(h, axis=0, keepdims=True)
        var = jnp.mean((h - mean) ** 2, axis=0, keepdims=True)
        h = (h - mean) * jax.lax.rsqrt(var + _EPS) * g + be
        h = h * jax.nn.sigmoid(h)
    w5, b5 = params["lin"][4]
    return jnp.dot(h.astype(jnp.bfloat16), w5.astype(jnp.bfloat16),
                   preferred_element_type=jnp.float32) + b5


if __name__ == "__main__":
    # Small demo shapes consistent with the module's forward.
    # Production callers should batch B >= 128-256 per kernel call to fill the
    # MXU M dimension and amortize the per-call overhead.
    B = 16
    num_cont_features = 6
    cat_dims = [5, 7, 4]
    embed_dims = [4, 3, 3]
    num_classes = 3

    key = jax.random.PRNGKey(0)
    k_params, k_cont, k_cat = jax.random.split(key, 3)

    params = init_params(k_params, num_cont_features, cat_dims, embed_dims,
                         num_classes)
    kparams = prepare_kernel_params(params, num_classes)

    x_cont = jax.random.normal(k_cont, (B, num_cont_features), jnp.float32)
    x_cat = jnp.stack(
        [jax.random.randint(jax.random.fold_in(k_cat, i), (B,), 0, cd)
         for i, cd in enumerate(cat_dims)], axis=1).astype(jnp.int32)

    out = torch_mlp_forward(x_cont, x_cat, params["emb"], kparams,
                            num_classes=num_classes)
    out = jax.block_until_ready(out)
    assert out.shape == (B, num_classes)

    # Tight gate vs a reference using the kernel's exact matmul precision.
    ref_bf16 = reference_forward_bf16(x_cont, x_cat, params)
    assert jnp.allclose(out, ref_bf16, atol=2e-3, rtol=2e-3), \
        "mismatch vs bf16-matmul reference"
    # Loose sanity gate vs the pure-f32, PyTorch-faithful reference
    # (bf16 MXU operands are the deliberate, review-requested deviation).
    ref_f32 = reference_forward_f32(x_cont, x_cat, params)
    assert jnp.allclose(out, ref_f32, atol=5e-2, rtol=5e-2), \
        "mismatch vs f32 reference"

    print("KERNEL_OK")
</pallas_src>

<mosaic_0001>
module attributes {stable_mosaic.version = 11 : i64} {
  func.func @_mlp_kernel(%arg0: memref<16x16xbf16, #tpu.memory_space<vmem>>, %arg1: memref<16x256xbf16, #tpu.memory_space<vmem>>, %arg2: memref<1x256xf32, #tpu.memory_space<vmem>>, %arg3: memref<1x256xf32, #tpu.memory_space<vmem>>, %arg4: memref<256x128xbf16, #tpu.memory_space<vmem>>, %arg5: memref<1x128xf32, #tpu.memory_space<vmem>>, %arg6: memref<1x128xf32, #tpu.memory_space<vmem>>, %arg7: memref<128x64xbf16, #tpu.memory_space<vmem>>, %arg8: memref<1x64xf32, #tpu.memory_space<vmem>>, %arg9: memref<1x64xf32, #tpu.memory_space<vmem>>, %arg10: memref<64x32xbf16, #tpu.memory_space<vmem>>, %arg11: memref<1x32xf32, #tpu.memory_space<vmem>>, %arg12: memref<1x32xf32, #tpu.memory_space<vmem>>, %arg13: memref<32x128xbf16, #tpu.memory_space<vmem>>, %arg14: memref<1x128xf32, #tpu.memory_space<vmem>>, %arg15: memref<16x128xf32, #tpu.memory_space<vmem>>) attributes {dimension_semantics = [], scalar_prefetch = 0 : i64, scratch_operands = 0 : i64, tpu.core_type = #tpu.core_type<tc>} {
    %c0 = arith.constant 0 : index
    %c0_0 = arith.constant 0 : index
    %0 = vector.load %arg0[%c0, %c0_0] : memref<16x16xbf16, #tpu.memory_space<vmem>>, vector<16x16xbf16>
    %c0_1 = arith.constant 0 : index
    %c0_2 = arith.constant 0 : index
    %1 = vector.load %arg1[%c0_1, %c0_2] : memref<16x256xbf16, #tpu.memory_space<vmem>>, vector<16x256xbf16>
    %cst = arith.constant dense<0.000000e+00> : vector<16x256xf32>
    %2 = tpu.matmul %0, %1, %cst {dimension_numbers = #tpu.dot_dimension_numbers<[1], [0], [0], [1], [0, 0, 1, 1], [], []>} : vector<16x16xbf16>, vector<16x256xbf16>, vector<16x256xf32> -> vector<16x256xf32>
    %cst_3 = arith.constant dense<0.000000e+00> : vector<256xf32>
    %3 = vector.multi_reduction <add>, %2, %cst_3 [0] : vector<16x256xf32> to vector<256xf32>
    %4 = vector.shape_cast %3 : vector<256xf32> to vector<1x256xf32>
    %5 = arith.mulf %2, %2 : vector<16x256xf32>
    %cst_4 = arith.constant dense<0.000000e+00> : vector<256xf32>
    %6 = vector.multi_reduction <add>, %5, %cst_4 [0] : vector<16x256xf32> to vector<256xf32>
    %7 = vector.shape_cast %6 : vector<256xf32> to vector<1x256xf32>
    %cst_5 = arith.constant 6.250000e-02 : f32
    %8 = vector.broadcast %cst_5 : f32 to vector<1x256xf32>
    %9 = arith.mulf %4, %8 : vector<1x256xf32>
    %cst_6 = arith.constant 6.250000e-02 : f32
    %10 = vector.broadcast %cst_6 : f32 to vector<1x256xf32>
    %11 = arith.mulf %7, %10 : vector<1x256xf32>
    %12 = arith.mulf %9, %9 : vector<1x256xf32>
    %13 = arith.subf %11, %12 : vector<1x256xf32>
    %cst_7 = arith.constant 0.000000e+00 : f32
    %14 = vector.broadcast %cst_7 : f32 to vector<1x256xf32>
    %15 = arith.maximumf %13, %14 : vector<1x256xf32>
    %cst_8 = arith.constant 9.99999974E-6 : f32
    %16 = vector.broadcast %cst_8 : f32 to vector<1x256xf32>
    %17 = arith.addf %15, %16 : vector<1x256xf32>
    %18 = math.rsqrt %17 : vector<1x256xf32>
    %c0_9 = arith.constant 0 : index
    %c0_10 = arith.constant 0 : index
    %19 = vector.load %arg2[%c0_9, %c0_10] : memref<1x256xf32, #tpu.memory_space<vmem>>, vector<1x256xf32>
    %20 = arith.mulf %18, %19 : vector<1x256xf32>
    %c0_11 = arith.constant 0 : index
    %c0_12 = arith.constant 0 : index
    %21 = vector.load %arg3[%c0_11, %c0_12] : memref<1x256xf32, #tpu.memory_space<vmem>>, vector<1x256xf32>
    %22 = arith.mulf %9, %20 : vector<1x256xf32>
    %23 = arith.subf %21, %22 : vector<1x256xf32>
    %24 = vector.broadcast %20 : vector<1x256xf32> to vector<16x256xf32>
    %25 = arith.mulf %2, %24 : vector<16x256xf32>
    %26 = vector.broadcast %23 : vector<1x256xf32> to vector<16x256xf32>
    %27 = arith.addf %25, %26 : vector<16x256xf32>
    %28 = arith.negf %27 : vector<16x256xf32>
    %29 = math.exp %28 : vector<16x256xf32>
    %cst_13 = arith.constant 1.000000e+00 : f32
    %30 = vector.broadcast %cst_13 : f32 to vector<16x256xf32>
    %31 = arith.addf %30, %29 : vector<16x256xf32>
    %32 = arith.divf %30, %31 : vector<16x256xf32>
    %33 = arith.mulf %27, %32 : vector<16x256xf32>
    %34 = arith.truncf %33 : vector<16x256xf32> to vector<16x256xbf16>
    %c0_14 = arith.constant 0 : index
    %c0_15 = arith.constant 0 : index
    %35 = vector.load %arg4[%c0_14, %c0_15] : memref<256x128xbf16, #tpu.memory_space<vmem>>, vector<256x128xbf16>
    %cst_16 = arith.constant dense<0.000000e+00> : vector<16x128xf32>
    %36 = tpu.matmul %34, %35, %cst_16 {dimension_numbers = #tpu.dot_dimension_numbers<[1], [0], [0], [1], [0, 0, 1, 1], [], []>} : vector<16x256xbf16>, vector<256x128xbf16>, vector<16x128xf32> -> vector<16x128xf32>
    %cst_17 = arith.constant dense<0.000000e+00> : vector<128xf32>
    %37 = vector.multi_reduction <add>, %36, %cst_17 [0] : vector<16x128xf32> to vector<128xf32>
    %38 = vector.shape_cast %37 : vector<128xf32> to vector<1x128xf32>
    %39 = arith.mulf %36, %36 : vector<16x128xf32>
    %cst_18 = arith.constant dense<0.000000e+00> : vector<128xf32>
    %40 = vector.multi_reduction <add>, %39, %cst_18 [0] : vector<16x128xf32> to vector<128xf32>
    %41 = vector.shape_cast %40 : vector<128xf32> to vector<1x128xf32>
    %cst_19 = arith.constant 6.250000e-02 : f32
    %42 = vector.broadcast %cst_19 : f32 to vector<1x128xf32>
    %43 = arith.mulf %38, %42 : vector<1x128xf32>
    %cst_20 = arith.constant 6.250000e-02 : f32
    %44 = vector.broadcast %cst_20 : f32 to vector<1x128xf32>
    %45 = arith.mulf %41, %44 : vector<1x128xf32>
    %46 = arith.mulf %43, %43 : vector<1x128xf32>
    %47 = arith.subf %45, %46 : vector<1x128xf32>
    %cst_21 = arith.constant 0.000000e+00 : f32
    %48 = vector.broadcast %cst_21 : f32 to vector<1x128xf32>
    %49 = arith.maximumf %47, %48 : vector<1x128xf32>
    %cst_22 = arith.constant 9.99999974E-6 : f32
    %50 = vector.broadcast %cst_22 : f32 to vector<1x128xf32>
    %51 = arith.addf %49, %50 : vector<1x128xf32>
    %52 = math.rsqrt %51 : vector<1x128xf32>
    %c0_23 = arith.constant 0 : index
    %c0_24 = arith.constant 0 : index
    %53 = vector.load %arg5[%c0_23, %c0_24] : memref<1x128xf32, #tpu.memory_space<vmem>>, vector<1x128xf32>
    %54 = arith.mulf %52, %53 : vector<1x128xf32>
    %c0_25 = arith.constant 0 : index
    %c0_26 = arith.constant 0 : index
    %55 = vector.load %arg6[%c0_25, %c0_26] : memref<1x128xf32, #tpu.memory_space<vmem>>, vector<1x128xf32>
    %56 = arith.mulf %43, %54 : vector<1x128xf32>
    %57 = arith.subf %55, %56 : vector<1x128xf32>
    %58 = vector.broadcast %54 : vector<1x128xf32> to vector<16x128xf32>
    %59 = arith.mulf %36, %58 : vector<16x128xf32>
    %60 = vector.broadcast %57 : vector<1x128xf32> to vector<16x128xf32>
    %61 = arith.addf %59, %60 : vector<16x128xf32>
    %62 = arith.negf %61 : vector<16x128xf32>
    %63 = math.exp %62 : vector<16x128xf32>
    %cst_27 = arith.constant 1.000000e+00 : f32
    %64 = vector.broadcast %cst_27 : f32 to vector<16x128xf32>
    %65 = arith.addf %64, %63 : vector<16x128xf32>
    %66 = arith.divf %64, %65 : vector<16x128xf32>
    %67 = arith.mulf %61, %66 : vector<16x128xf32>
    %68 = arith.truncf %67 : vector<16x128xf32> to vector<16x128xbf16>
    %c0_28 = arith.constant 0 : index
    %c0_29 = arith.constant 0 : index
    %69 = vector.load %arg7[%c0_28, %c0_29] : memref<128x64xbf16, #tpu.memory_space<vmem>>, vector<128x64xbf16>
    %cst_30 = arith.constant dense<0.000000e+00> : vector<16x64xf32>
    %70 = tpu.matmul %68, %69, %cst_30 {dimension_numbers = #tpu.dot_dimension_numbers<[1], [0], [0], [1], [0, 0, 1, 1], [], []>} : vector<16x128xbf16>, vector<128x64xbf16>, vector<16x64xf32> -> vector<16x64xf32>
    %cst_31 = arith.constant dense<0.000000e+00> : vector<64xf32>
    %71 = vector.multi_reduction <add>, %70, %cst_31 [0] : vector<16x64xf32> to vector<64xf32>
    %72 = vector.shape_cast %71 : vector<64xf32> to vector<1x64xf32>
    %73 = arith.mulf %70, %70 : vector<16x64xf32>
    %cst_32 = arith.constant dense<0.000000e+00> : vector<64xf32>
    %74 = vector.multi_reduction <add>, %73, %cst_32 [0] : vector<16x64xf32> to vector<64xf32>
    %75 = vector.shape_cast %74 : vector<64xf32> to vector<1x64xf32>
    %cst_33 = arith.constant 6.250000e-02 : f32
    %76 = vector.broadcast %cst_33 : f32 to vector<1x64xf32>
    %77 = arith.mulf %72, %76 : vector<1x64xf32>
    %cst_34 = arith.constant 6.250000e-02 : f32
    %78 = vector.broadcast %cst_34 : f32 to vector<1x64xf32>
    %79 = arith.mulf %75, %78 : vector<1x64xf32>
    %80 = arith.mulf %77, %77 : vector<1x64xf32>
    %81 = arith.subf %79, %80 : vector<1x64xf32>
    %cst_35 = arith.constant 0.000000e+00 : f32
    %82 = vector.broadcast %cst_35 : f32 to vector<1x64xf32>
    %83 = arith.maximumf %81, %82 : vector<1x64xf32>
    %cst_36 = arith.constant 9.99999974E-6 : f32
    %84 = vector.broadcast %cst_36 : f32 to vector<1x64xf32>
    %85 = arith.addf %83, %84 : vector<1x64xf32>
    %86 = math.rsqrt %85 : vector<1x64xf32>
    %c0_37 = arith.constant 0 : index
    %c0_38 = arith.constant 0 : index
    %87 = vector.load %arg8[%c0_37, %c0_38] : memref<1x64xf32, #tpu.memory_space<vmem>>, vector<1x64xf32>
    %88 = arith.mulf %86, %87 : vector<1x64xf32>
    %c0_39 = arith.constant 0 : index
    %c0_40 = arith.constant 0 : index
    %89 = vector.load %arg9[%c0_39, %c0_40] : memref<1x64xf32, #tpu.memory_space<vmem>>, vector<1x64xf32>
    %90 = arith.mulf %77, %88 : vector<1x64xf32>
    %91 = arith.subf %89, %90 : vector<1x64xf32>
    %92 = vector.broadcast %88 : vector<1x64xf32> to vector<16x64xf32>
    %93 = arith.mulf %70, %92 : vector<16x64xf32>
    %94 = vector.broadcast %91 : vector<1x64xf32> to vector<16x64xf32>
    %95 = arith.addf %93, %94 : vector<16x64xf32>
    %96 = arith.negf %95 : vector<16x64xf32>
    %97 = math.exp %96 : vector<16x64xf32>
    %cst_41 = arith.constant 1.000000e+00 : f32
    %98 = vector.broadcast %cst_41 : f32 to vector<16x64xf32>
    %99 = arith.addf %98, %97 : vector<16x64xf32>
    %100 = arith.divf %98, %99 : vector<16x64xf32>
    %101 = arith.mulf %95, %100 : vector<16x64xf32>
    %102 = arith.truncf %101 : vector<16x64xf32> to vector<16x64xbf16>
    %c0_42 = arith.constant 0 : index
    %c0_43 = arith.constant 0 : index
    %103 = vector.load %arg10[%c0_42, %c0_43] : memref<64x32xbf16, #tpu.memory_space<vmem>>, vector<64x32xbf16>
    %cst_44 = arith.constant dense<0.000000e+00> : vector<16x32xf32>
    %104 = tpu.matmul %102, %103, %cst_44 {dimension_numbers = #tpu.dot_dimension_numbers<[1], [0], [0], [1], [0, 0, 1, 1], [], []>} : vector<16x64xbf16>, vector<64x32xbf16>, vector<16x32xf32> -> vector<16x32xf32>
    %cst_45 = arith.constant dense<0.000000e+00> : vector<32xf32>
    %105 = vector.multi_reduction <add>, %104, %cst_45 [0] : vector<16x32xf32> to vector<32xf32>
    %106 = vector.shape_cast %105 : vector<32xf32> to vector<1x32xf32>
    %107 = arith.mulf %104, %104 : vector<16x32xf32>
    %cst_46 = arith.constant dense<0.000000e+00> : vector<32xf32>
    %108 = vector.multi_reduction <add>, %107, %cst_46 [0] : vector<16x32xf32> to vector<32xf32>
    %109 = vector.shape_cast %108 : vector<32xf32> to vector<1x32xf32>
    %cst_47 = arith.constant 6.250000e-02 : f32
    %110 = vector.broadcast %cst_47 : f32 to vector<1x32xf32>
    %111 = arith.mulf %106, %110 : vector<1x32xf32>
    %cst_48 = arith.constant 6.250000e-02 : f32
    %112 = vector.broadcast %cst_48 : f32 to vector<1x32xf32>
    %113 = arith.mulf %109, %112 : vector<1x32xf32>
    %114 = arith.mulf %111, %111 : vector<1x32xf32>
    %115 = arith.subf %113, %114 : vector<1x32xf32>
    %cst_49 = arith.constant 0.000000e+00 : f32
    %116 = vector.broadcast %cst_49 : f32 to vector<1x32xf32>
    %117 = arith.maximumf %115, %116 : vector<1x32xf32>
    %cst_50 = arith.constant 9.99999974E-6 : f32
    %118 = vector.broadcast %cst_50 : f32 to vector<1x32xf32>
    %119 = arith.addf %117, %118 : vector<1x32xf32>
    %120 = math.rsqrt %119 : vector<1x32xf32>
    %c0_51 = arith.constant 0 : index
    %c0_52 = arith.constant 0 : index
    %121 = vector.load %arg11[%c0_51, %c0_52] : memref<1x32xf32, #tpu.memory_space<vmem>>, vector<1x32xf32>
    %122 = arith.mulf %120, %121 : vector<1x32xf32>
    %c0_53 = arith.constant 0 : index
    %c0_54 = arith.constant 0 : index
    %123 = vector.load %arg12[%c0_53, %c0_54] : memref<1x32xf32, #tpu.memory_space<vmem>>, vector<1x32xf32>
    %124 = arith.mulf %111, %122 : vector<1x32xf32>
    %125 = arith.subf %123, %124 : vector<1x32xf32>
    %126 = vector.broadcast %122 : vector<1x32xf32> to vector<16x32xf32>
    %127 = arith.mulf %104, %126 : vector<16x32xf32>
    %128 = vector.broadcast %125 : vector<1x32xf32> to vector<16x32xf32>
    %129 = arith.addf %127, %128 : vector<16x32xf32>
    %130 = arith.negf %129 : vector<16x32xf32>
    %131 = math.exp %130 : vector<16x32xf32>
    %cst_55 = arith.constant 1.000000e+00 : f32
    %132 = vector.broadcast %cst_55 : f32 to vector<16x32xf32>
    %133 = arith.addf %132, %131 : vector<16x32xf32>
    %134 = arith.divf %132, %133 : vector<16x32xf32>
    %135 = arith.mulf %129, %134 : vector<16x32xf32>
    %136 = arith.truncf %135 : vector<16x32xf32> to vector<16x32xbf16>
    %c0_56 = arith.constant 0 : index
    %c0_57 = arith.constant 0 : index
    %137 = vector.load %arg13[%c0_56, %c0_57] : memref<32x128xbf16, #tpu.memory_space<vmem>>, vector<32x128xbf16>
    %cst_58 = arith.constant dense<0.000000e+00> : vector<16x128xf32>
    %138 = tpu.matmul %136, %137, %cst_58 {dimension_numbers = #tpu.dot_dimension_numbers<[1], [0], [0], [1], [0, 0, 1, 1], [], []>} : vector<16x32xbf16>, vector<32x128xbf16>, vector<16x128xf32> -> vector<16x128xf32>
    %c0_59 = arith.constant 0 : index
    %c0_60 = arith.constant 0 : index
    %139 = vector.load %arg14[%c0_59, %c0_60] : memref<1x128xf32, #tpu.memory_space<vmem>>, vector<1x128xf32>
    %140 = vector.broadcast %139 : vector<1x128xf32> to vector<16x128xf32>
    %141 = arith.addf %138, %140 : vector<16x128xf32>
    %c0_61 = arith.constant 0 : index
    %c0_62 = arith.constant 0 : index
    %142 = vector.load %arg15[%c0_61, %c0_62] : memref<16x128xf32, #tpu.memory_space<vmem>>, vector<16x128xf32>
    tpu.vector_store %arg15[%c0_61, %c0_62], %141 {strides = array<i32>} : memref<16x128xf32, #tpu.memory_space<vmem>>, vector<16x128xf32>,
    return
  }
}

</mosaic_0001>

<bundles_post_ra>
// kernel: torch_mlp_forward.1
= control target key start
LH: loop header
LB: loop body
LE: loop exit
PB: predicated region body
PF: predicated region fallthrough
CT: control target
= control target key end

     0   :  { %vm70_vm0 = vcmask 130048   ;;  %vm180_vm7 = vcmask 1040384   ;;  %s1397_s1 = inlined_call_operand.vmem [shape: bf16[16,256], index: 1, kind: input, shape index: {}]   ;;  %s1398_s0 = inlined_call_operand.vmem [shape: bf16[16,16], index: 0, kind: input, shape index: {}]   ;;  %s1399_s4 = inlined_call_operand.vmem [shape: bf16[256,128], index: 4, kind: input, shape index: {}]   ;;  %s1400_s2 = inlined_call_operand.vmem [shape: f32[1,256], index: 2, kind: input, shape index: {}]   ;;  %s1401_s3 = inlined_call_operand.vmem [shape: f32[1,256], index: 3, kind: input, shape index: {}]   ;;  %s1402_s7 = inlined_call_operand.vmem [shape: bf16[128,64], index: 7, kind: input, shape index: {}]   ;;  %s1403_s5 = inlined_call_operand.vmem [shape: f32[1,128], index: 5, kind: input, shape index: {}]   ;;  %s1404_s6 = inlined_call_operand.vmem [shape: f32[1,128], index: 6, kind: input, shape index: {}]   ;;  %s1405_s10 = inlined_call_operand.vmem [shape: bf16[64,32], index: 10, kind: input, shape index: {}]   ;;  %s1406_s8 = inlined_call_operand.vmem [shape: f32[1,64], index: 8, kind: input, shape index: {}]   ;;  %s1407_s9 = inlined_call_operand.vmem [shape: f32[1,64], index: 9, kind: input, shape index: {}]   ;;  %s1408_s14 = inlined_call_operand.vmem [shape: f32[1,128], index: 14, kind: input, shape index: {}]   ;;  %s1409_s11 = inlined_call_operand.vmem [shape: f32[1,32], index: 11, kind: input, shape index: {}]   ;;  %s1410_s12 = inlined_call_operand.vmem [shape: f32[1,32], index: 12, kind: input, shape index: {}]   ;;  %s1411_s13 = inlined_call_operand.vmem [shape: bf16[32,128], index: 13, kind: input, shape index: {}]   ;;  %s1412_s15 = inlined_call_operand.vmem [shape: f32[16,128], index: 15, kind: output, shape index: {}]  }
   0x1   :  { %v881_v0 = vld [vmem:[%s1397_s1] sm:$0xf]  ;;  %v1023_v1 = vld [vmem:[%s1397_s1 + $0x4] sm:$0xf0]  ;;  %v1022_v2 = vld [vmem:[%s1397_s1 + $0x4] sm:$0xf] }
   0x2   :  { %v882_v3 = vor.u32 %v1023_v1, %v881_v0  ;;  %v883_v4 = vld [vmem:[%s1397_s1 + $0x8] sm:$0xf0]  ;;  %v1021_v6 = vld [vmem:[%s1398_s0] sm:$0xff]  ;;  %v1031_v45 = vld [vmem:[%s1399_s4 + $0x38] sm:$0xff] }
   0x3   :  { %v886_v5 = vor.u32 %v1022_v2, %v883_v4  ;;  %v1039_v46 = vld [vmem:[%s1399_s4 + $0x78] sm:$0xff]  ;;  %409 = vmatpush.bf16.msra.mxu2 %v1031_v45  ;;  %v1030_v51 = vld [vmem:[%s1399_s4 + $0x30] sm:$0xff]  ;;  %v1029_v57 = vld [vmem:[%s1399_s4 + $0x28] sm:$0xff] }
   0x4   :  { %81 = vmatpush.bf16.msra.mxu0 %v882_v3  ;;  %423 = vmatpush.bf16.msra.mxu3 %v1039_v46  ;;  %v1038_v52 = vld [vmem:[%s1399_s4 + $0x70] sm:$0xff]  ;;  %v1037_v58 = vld [vmem:[%s1399_s4 + $0x68] sm:$0xff]  ;;  %v1028_v61 = vld [vmem:[%s1399_s4 + $0x20] sm:$0xff] }
   0x5   :  { %95 = vmatpush.bf16.msra.mxu1 %v886_v5  ;;  %v1036_v62 = vld [vmem:[%s1399_s4 + $0x60] sm:$0xff]  ;;  %v1027_v63 = vld [vmem:[%s1399_s4 + $0x18] sm:$0xff] }
   0x6   :  { %v1035_v0 = vld [vmem:[%s1399_s4 + $0x58] sm:$0xff] }
   0x7   :  { %887 = vmatmul.msk.bf16.vlgmr.msra.gmra.mxu0 %vm70_vm0, %v1021_v6  ;;  %410 = vmatpush.bf16.msra.mxu2 %v1030_v51 }
   0x8   :  { %888 = vmatmul.msk.bf16.vlgmr.msra.gmra.mxu1 %vm70_vm0, %v1021_v6  ;;  %424 = vmatpush.bf16.msra.mxu3 %v1038_v52  ;;  %v1026_v6 = vld [vmem:[%s1399_s4 + $0x10] sm:$0xff] }
   0xb   :  { %411 = vmatpush.bf16.msra.mxu2 %v1029_v57 }
   0xc   :  { %425 = vmatpush.bf16.msra.mxu3 %v1037_v58 }
   0xf   :  { %412 = vmatpush.bf16.msra.mxu2 %v1028_v61 }
  0x10   :  { %426 = vmatpush.bf16.msra.mxu3 %v1036_v62 }
  0x13   :  { %413 = vmatpush.bf16.msra.mxu2 %v1027_v63 }
  0x14   :  { %427 = vmatpush.bf16.msra.mxu3 %v1035_v0 }
  0x17   :  { %414 = vmatpush.bf16.msra.mxu2 %v1026_v6 }
  0x84   :  { %v1200_v7 = vpop.f32.mrf.mxu0 }
  0x85   :  { %v1202_v8 = vpop.f32.mrf.mxu1  ;;  %v116_v10 = vmul.f32 %v1200_v7, %v1200_v7 }
  0x86   :  { %v117_v14 = vmul.f32 %v1202_v8, %v1202_v8 }
  0x8c   :  { %v1204_v9 = vpop.f32.mrf.mxu0 }
  0x8d   :  { %v102_v11 = vadd.f32 %v1204_v9, %v1200_v7  ;;  %v118_v12 = vmul.f32 %v1204_v9, %v1204_v9  ;;  %v1212_v13 = vpop.f32.mrf.mxu1 }
  0x8e   :  { %v109_v15 = vadd.f32 %v1212_v13, %v1202_v8  ;;  %v119_v16 = vmul.f32 %v1212_v13, %v1212_v13 }
  0x8f   :  { %v103_v17 = vrot.slane %v102_v11, 4  ;;  %v120_v18 = vadd.f32 %v118_v12, %v116_v10  ;;  %v1034_v10 = vld [vmem:[%s1399_s4 + $0x50] sm:$0xff] }
  0x90   :  { %v110_v19 = vrot.slane %v109_v15, 4  ;;  %v127_v20 = vadd.f32 %v119_v16, %v117_v14  ;;  %v166_v14 = vld [vmem:[%s1400_s2] sm:$0x3]  ;;  %428 = vmatpush.bf16.msra.mxu3 %v1034_v10 }
  0x91   :  { %v104_v21 = vadd.f32 %v103_v17, %v102_v11  ;;  %v121_v22 = vrot.slane %v120_v18, 4  ;;  %v1025_v17 = vld [vmem:[%s1399_s4 + $0x8] sm:$0xff] }
  0x92   :  { %v111_v23 = vadd.f32 %v110_v19, %v109_v15  ;;  %v128_v24 = vrot.slane %v127_v20, 4  ;;  %415 = vmatpush.bf16.msra.mxu2 %v1025_v17 }
  0x93   :  { %v105_v25 = vrot.slane %v104_v21, 2  ;;  %v122_v26 = vadd.f32 %v121_v22, %v120_v18  ;;  %v1033_v18 = vld [vmem:[%s1399_s4 + $0x48] sm:$0xff]  ;;  %v169_v22 = vperm.slane %v166_v14, 1 }
  0x94   :  { %v112_v27 = vrot.slane %v111_v23, 2  ;;  %v129_v28 = vadd.f32 %v128_v24, %v127_v20  ;;  %429 = vmatpush.bf16.msra.mxu3 %v1033_v18 }
  0x95   :  { %v106_v29 = vadd.f32 %v105_v25, %v104_v21  ;;  %v123_v30 = vrot.slane %v122_v26, 2  ;;  %v168_v21 = vperm.slane %v166_v14, 0  ;;  %v1024_v25 = vld [vmem:[%s1399_s4] sm:$0xff] }
  0x96   :  { %v113_v31 = vadd.f32 %v112_v27, %v111_v23  ;;  %v130_v32 = vrot.slane %v129_v28, 2  ;;  %416 = vmatpush.bf16.msra.mxu2 %v1024_v25 }
  0x97   :  { %v107_v33 = vrot.slane %v106_v29, 1  ;;  %v124_v34 = vadd.f32 %v123_v30, %v122_v26  ;;  %v1032_v26 = vld [vmem:[%s1399_s4 + $0x40] sm:$0xff] }
  0x98   :  { %v114_v35 = vrot.slane %v113_v31, 1  ;;  %v131_v36 = vadd.f32 %v130_v32, %v129_v28  ;;  %430 = vmatpush.bf16.msra.mxu3 %v1032_v26 }
  0x99   :  { %v108_v37 = vadd.f32 %v107_v33, %v106_v29  ;;  %v125_v38 = vrot.slane %v124_v34, 1 }
  0x9a   :  { %v115_v39 = vadd.f32 %v114_v35, %v113_v31  ;;  %v132_v40 = vrot.slane %v131_v36, 1 }
  0x9b   :  { %v126_v41 = vadd.f32 %v125_v38, %v124_v34  ;;  %v1220_v42 = vmul.f32 0.0625, %v108_v37  ;;  %v174_v34 = vld [vmem:[%s1401_s3] sm:$0x3] }
  0x9c   :  { %v133_v43 = vadd.f32 %v132_v40, %v131_v36  ;;  %v1222_v44 = vmul.f32 0.0625, %v115_v39 }
  0x9d   :  { %v136_v47 = vmul.f32 0.0625, %v126_v41  ;;  %v138_v48 = vmul.f32 %v1220_v42, %v1220_v42 }
  0x9e   :  { %v137_v49 = vmul.f32 0.0625, %v133_v43  ;;  %v139_v50 = vmul.f32 %v1222_v44, %v1222_v44 }
  0x9f   :  { %v140_v53 = vsub.f32 %v136_v47, %v138_v48 }
  0xa0   :  { %v141_v54 = vsub.f32 %v137_v49, %v139_v50 }
  0xa1   :  { %v142_v55 = vmax.f32 %v140_v53, 0.0 }
  0xa2   :  { %v143_v56 = vmax.f32 %v141_v54, 0.0 }
  0xa3   :  { %v144_v59 = vadd.f32 1e-05, %v142_v55 }
  0xa4   :  { %v145_v60 = vadd.f32 1e-05, %v143_v56 }
  0xa5   :  { %1055 = vrsqrt.f32 %v144_v59  ;;  %vm152_vm3 = vweird.f32 %v144_v59 }
  0xa6   :  { %1057 = vrsqrt.f32 %v145_v60  ;;  %vm162_vm5 = vweird.f32 %v145_v60 }
  0xab   :  { %v1056_v1 = vpop.eup %1055 }
  0xac   :  { %v1058_v2 = vpop.eup %1057  ;;  %v147_v3 = vmul.f32 %v1056_v1, %v144_v59  ;;  %vm153_vm1 = vweird.f32 %v1056_v1 }
  0xad   :  { %v157_v4 = vmul.f32 %v1058_v2, %v145_v60  ;;  %vm163_vm2 = vweird.f32 %v1058_v2  ;;  %vm154_vm4 = vmor %vm152_vm3, %vm153_vm1 }
  0xae   :  { %v148_v5 = vmul.f32 %v1056_v1, %v147_v3  ;;  %vm164_vm6 = vmor %vm162_vm5, %vm163_vm2 }
  0xaf   :  { %v158_v11 = vmul.f32 %v1058_v2, %v157_v4 }
  0xb0   :  { %v149_v12 = vmul.f32 0.5, %v148_v5 }
  0xb1   :  { %v159_v15 = vmul.f32 0.5, %v158_v11 }
  0xb2   :  { %v150_v16 = vsub.f32 1.5, %v149_v12  ;;  %v1044_v12 = vld [vmem:[%s1402_s7 + $0x20] sm:$0xff] }
  0xb3   :  { %v160_v19 = vsub.f32 1.5, %v159_v15 }
  0xb4   :  { %v151_v20 = vmul.f32 %v1056_v1, %v150_v16 }
  0xb5   :  { %v161_v23 = vmul.f32 %v1058_v2, %v160_v19 }
  0xb6   :  { %v155_v24 = vsel %vm154_vm4, %v1056_v1, %v151_v20 }
  0xb7   :  { %v165_v27 = vsel %vm164_vm6, %v1058_v2, %v161_v23  ;;  %v172_v28 = vmul.f32 %v168_v21, %v155_v24  ;;  %v1047_v2 = vld [vmem:[%s1402_s7 + $0x38] sm:$0xff] }
  0xb8   :  { %v173_v29 = vmul.f32 %v169_v22, %v165_v27  ;;  %587 = vmatpush.bf16.msrb.mxu0 %v1047_v2 }
  0xb9   :  { %v175_v31 = vmul.f32 %v172_v28, %v1220_v42  ;;  %v184_v32 = vperm.slane %v172_v28, 0 }
  0xba   :  { %v176_v30 = vmul.f32 %v173_v29, %v1222_v44  ;;  %v185_v35 = vperm.slane %v173_v29, 0 }
  0xbb   :  { %v188_v38 = vmul.f32 %v184_v32, %v1204_v9  ;;  %v186_v39 = vmul.f32 %v184_v32, %v1200_v7 }
  0xbc   :  { %v179_v33 = vrot.slane %v176_v30, 7  ;;  %v189_v40 = vmul.f32 %v185_v35, %v1212_v13  ;;  %v187_v43 = vmul.f32 %v185_v35, %v1202_v8 }
  0xbe   :  { %v181_v36 = vsel %vm180_vm7, %v175_v31, %v179_v33 }
  0xbf   :  { %v183_v37 = vsub.f32 %v174_v34, %v181_v36 }
  0xc1   :  { %v191_v41 = vperm.slane %v183_v37, 0  ;;  %v192_v44 = vperm.slane %v183_v37, 1 }
  0xc3   :  { %v1288_v42 = vadd.f32 %v191_v41, %v186_v39  ;;  %v1290_v45 = vadd.f32 %v191_v41, %v188_v38  ;;  %v1292_v46 = vadd.f32 %v192_v44, %v187_v43  ;;  %v1294_v47 = vadd.f32 %v192_v44, %v189_v40 }
  0xc5   :  { %v889_v48 = vmul.f32 -1.442695, %v1288_v42  ;;  %v891_v9 = vmul.f32 -1.442695, %v1290_v45  ;;  %v890_v7 = vmul.f32 -1.442695, %v1292_v46 }
  0xc6   :  { %v892_v13 = vmul.f32 -1.442695, %v1294_v47 }
  0xc7   :  { %1059 = vpow2.f32 %v889_v48 }
  0xc8   :  { %1061 = vpow2.f32 %v891_v9 }
  0xc9   :  { %1063 = vpow2.f32 %v890_v7 }
  0xca   :  { %1065 = vpow2.f32 %v892_v13 }
  0xcd   :  { %v1060_v8 = vpop.eup %1059 }
  0xce   :  { %v1062_v49 = vpop.eup %1061  ;;  %v211_v50 = vadd.f32 1.0, %v1060_v8 }
  0xcf   :  { %v1064_v51 = vpop.eup %1063  ;;  %v213_v52 = vadd.f32 1.0, %v1062_v49 }
  0xd0   :  { %v1066_v53 = vpop.eup %1065  ;;  %1067 = vrcp.f32 %v211_v50  ;;  %v212_v54 = vadd.f32 1.0, %v1064_v51  ;;  %v224_v57 = vand.u32 2147483647, %v211_v50  ;;  %v226_v60 = vand.u32 2147483648, %v211_v50 }
  0xd1   :  { %1069 = vrcp.f32 %v213_v52  ;;  %v214_v55 = vadd.f32 1.0, %v1066_v53  ;;  %v254_v62 = vand.u32 2147483647, %v213_v52  ;;  %v256_v0 = vand.u32 2147483648, %v213_v52 }
  0xd2   :  { %1071 = vrcp.f32 %v212_v54  ;;  %vm220_vm8 = vweird.f32 %v211_v50  ;;  %vm1300_vm9 = vcmp.eq.f32.partialorder %v224_v57, 8.507059e+37  ;;  %vm250_vm10 = vweird.f32 %v213_v52 }
  0xd3   :  { %1073 = vrcp.f32 %v214_v55  ;;  %v227_v6 = vor.u32 1.1754944e-38, %v226_v60  ;;  %vm1304_vm13 = vcmp.eq.f32.partialorder %v254_v62, 8.507059e+37  ;;  %v257_v16 = vor.u32 1.1754944e-38, %v256_v0 }
  0xd4   :  { %v239_v18 = vand.u32 2147483647, %v212_v54  ;;  %v241_v20 = vand.u32 2147483648, %v212_v54  ;;  %v269_v22 = vand.u32 2147483647, %v214_v55  ;;  %v271_v25 = vand.u32 2147483648, %v214_v55 }
  0xd5   :  { %vm235_vm2 = vweird.f32 %v212_v54  ;;  %vm265_vm4 = vweird.f32 %v214_v55 }
  0xd6   :  { %v1068_v56 = vpop.eup %1067  ;;  %v242_v33 = vor.u32 1.1754944e-38, %v241_v20  ;;  %vm240_vm5 = vcmp.eq.f32.partialorder %v239_v18, 8.507059e+37  ;;  %v272_v36 = vor.u32 1.1754944e-38, %v271_v25  ;;  %vm270_vm7 = vcmp.eq.f32.partialorder %v269_v22, 8.507059e+37  ;;  %v1042_v18 = vld [vmem:[%s1402_s7 + $0x10] sm:$0xff]  ;;  %v1041_v22 = vld [vmem:[%s1402_s7 + $0x8] sm:$0xff] }
  0xd7   :  { %v1070_v58 = vpop.eup %1069  ;;  %v216_v59 = vmul.f32 %v1068_v56, %v211_v50  ;;  %vm221_vm11 = vweird.f32 %v1068_v56  ;;  %v469_v20 = vld [vmem:[%s1403_s5] sm:$0x1] }
  0xd8   :  { %v246_v61 = vmul.f32 %v1070_v58, %v213_v52  ;;  %v1072_v1 = vpop.eup %1071  ;;  %vm251_vm12 = vweird.f32 %v1070_v58  ;;  %vm222_vm14 = vmor %vm220_vm8, %vm221_vm11 }
  0xd9   :  { %v217_v63 = vsub.f32 1.0, %v216_v59  ;;  %v1074_v4 = vpop.eup %1073  ;;  %v231_v10 = vmul.f32 %v1072_v1, %v212_v54  ;;  %vm252_vm15 = vmor %vm250_vm10, %vm251_vm12  ;;  %vm236_vm0 = vweird.f32 %v1072_v1 }
  0xda   :  { %v247_v3 = vsub.f32 1.0, %v246_v61  ;;  %v261_v14 = vmul.f32 %v1074_v4, %v214_v55  ;;  %vm266_vm1 = vweird.f32 %v1074_v4  ;;  %vm237_vm3 = vmor %vm235_vm2, %vm236_vm0 }
  0xdb   :  { %v218_v5 = vmul.f32 %v1068_v56, %v217_v63  ;;  %v232_v17 = vsub.f32 1.0, %v231_v10  ;;  %vm267_vm6 = vmor %vm265_vm4, %vm266_vm1 }
  0xdc   :  { %v248_v11 = vmul.f32 %v1070_v58, %v247_v3  ;;  %v262_v21 = vsub.f32 1.0, %v261_v14 }
  0xdd   :  { %v219_v15 = vadd.f32 %v1068_v56, %v218_v5  ;;  %v233_v24 = vmul.f32 %v1072_v1, %v232_v17  ;;  %v1046_v5 = vld [vmem:[%s1402_s7 + $0x30] sm:$0xff] }
  0xde   :  { %v249_v19 = vadd.f32 %v1070_v58, %v248_v11  ;;  %v263_v28 = vmul.f32 %v1074_v4, %v262_v21  ;;  %588 = vmatpush.bf16.msrb.mxu0 %v1046_v5 }
  0xdf   :  { %v223_v23 = vsel %vm222_vm14, %v1068_v56, %v219_v15  ;;  %v234_v31 = vadd.f32 %v1072_v1, %v233_v24  ;;  %v1043_v15 = vld [vmem:[%s1402_s7 + $0x18] sm:$0xff]  ;;  %v471_v24 = vld [vmem:[%s1404_s6] sm:$0x1] }
  0xe0   :  { %v228_v26 = vsel %vm1300_vm9, %v227_v6, %v223_v23  ;;  %v253_v27 = vsel %vm252_vm15, %v1070_v58, %v249_v19  ;;  %v264_v34 = vadd.f32 %v1074_v4, %v263_v28  ;;  %v1045_v6 = vld [vmem:[%s1402_s7 + $0x28] sm:$0xff] }
  0xe1   :  { %v258_v29 = vsel %vm1304_vm13, %v257_v16, %v253_v27  ;;  %v275_v30 = vmul.f32 %v228_v26, %v1288_v42  ;;  %v238_v35 = vsel %vm237_vm3, %v1072_v1, %v234_v31  ;;  %v1040_v27 = vld [vmem:[%s1402_s7] sm:$0xff]  ;;  %vm601_vm3 = vcmask 523264  }
  0xe2   :  { %v277_v32 = vmul.f32 %v258_v29, %v1290_v45  ;;  %v243_v38 = vsel %vm240_vm5, %v242_v33, %v238_v35  ;;  %v268_v39 = vsel %vm267_vm6, %v1074_v4, %v264_v34  ;;  %589 = vmatpush.bf16.msrb.mxu0 %v1045_v6 }
  0xe3   :  { %v273_v40 = vsel %vm270_vm7, %v272_v36, %v268_v39  ;;  %v276_v41 = vmul.f32 %v243_v38, %v1292_v46 }
  0xe4   :  { %v279_v37 = vpack.c.bf16 %v277_v32, %v275_v30  ;;  %v278_v43 = vmul.f32 %v273_v40, %v1294_v47 }
  0xe6   :  { %417 = vmatmul.bf16.vlgmr.msra.gmra.mxu2 %v279_v37  ;;  %v280_v44 = vpack.c.bf16 %v278_v43, %v276_v41  ;;  %590 = vmatpush.bf16.msrb.mxu0 %v1044_v12 }
  0xe8   :  { %431 = vmatmul.bf16.vlgmr.msra.gmra.mxu3 %v280_v44 }
  0xea   :  { %591 = vmatpush.bf16.msrb.mxu0 %v1043_v15 }
  0xee   :  { %592 = vmatpush.bf16.msrb.mxu0 %v1042_v18 }
  0xf2   :  { %593 = vmatpush.bf16.msrb.mxu0 %v1041_v22 }
  0xf6   :  { %594 = vmatpush.bf16.msrb.mxu0 %v1040_v27 }
 0x169   :  { %v418_v42 = vpop.f32.mrf.mxu2 }
 0x16b   :  { %v432_v45 = vpop.f32.mrf.mxu3 }
 0x16c   :  { %v433_v9 = vadd.f32 %v432_v45, %v418_v42 }
 0x16e   :  { %v444_v8 = vmul.f32 %v433_v9, %v433_v9 }
 0x171   :  { %v420_v48 = vpop.f32.mrf.mxu2 }
 0x173   :  { %v434_v7 = vpop.f32.mrf.mxu3 }
 0x174   :  { %v435_v13 = vadd.f32 %v434_v7, %v420_v48 }
 0x176   :  { %v437_v49 = vadd.f32 %v435_v13, %v433_v9  ;;  %v445_v50 = vmul.f32 %v435_v13, %v435_v13 }
 0x178   :  { %v438_v51 = vrot.slane %v437_v49, 4  ;;  %v446_v52 = vadd.f32 %v445_v50, %v444_v8 }
 0x17a   :  { %v439_v53 = vadd.f32 %v438_v51, %v437_v49  ;;  %v447_v54 = vrot.slane %v446_v52, 4 }
 0x17c   :  { %v440_v55 = vrot.slane %v439_v53, 2  ;;  %v448_v46 = vadd.f32 %v447_v54, %v446_v52 }
 0x17e   :  { %v441_v56 = vadd.f32 %v440_v55, %v439_v53  ;;  %v449_v57 = vrot.slane %v448_v46, 2 }
 0x180   :  { %v442_v47 = vrot.slane %v441_v56, 1  ;;  %v450_v58 = vadd.f32 %v449_v57, %v448_v46 }
 0x182   :  { %v443_v59 = vadd.f32 %v442_v47, %v441_v56  ;;  %v451_v60 = vrot.slane %v450_v58, 1 }
 0x184   :  { %v452_v61 = vadd.f32 %v451_v60, %v450_v58  ;;  %v453_v62 = vmul.f32 0.0625, %v443_v59 }
 0x186   :  { %v454_v63 = vmul.f32 0.0625, %v452_v61  ;;  %v455_v0 = vmul.f32 %v453_v62, %v453_v62 }
 0x188   :  { %v456_v1 = vsub.f32 %v454_v63, %v455_v0 }
 0x18a   :  { %v457_v3 = vmax.f32 %v456_v1, 0.0 }
 0x18c   :  { %v458_v4 = vadd.f32 1e-05, %v457_v3 }
 0x18e   :  { %1075 = vrsqrt.f32 %v458_v4  ;;  %vm465_vm9 = vweird.f32 %v458_v4 }
 0x194   :  { %v1076_v10 = vpop.eup %1075 }
 0x195   :  { %v460_v11 = vmul.f32 %v1076_v10, %v458_v4  ;;  %vm466_vm8 = vweird.f32 %v1076_v10 }
 0x196   :  { %vm467_vm10 = vmor %vm465_vm9, %vm466_vm8 }
 0x197   :  { %v461_v14 = vmul.f32 %v1076_v10, %v460_v11 }
 0x199   :  { %v462_v16 = vmul.f32 0.5, %v461_v14 }
 0x19b   :  { %v463_v17 = vsub.f32 1.5, %v462_v16 }
 0x19d   :  { %v464_v19 = vmul.f32 %v1076_v10, %v463_v17 }
 0x19f   :  { %v468_v21 = vsel %vm467_vm10, %v1076_v10, %v464_v19 }
 0x1a0   :  { %v470_v23 = vmul.f32 %v469_v20, %v468_v21 }
 0x1a2   :  { %v472_v25 = vmul.f32 %v470_v23, %v453_v62  ;;  %v474_v26 = vperm.slane %v470_v23, 0 }
 0x1a4   :  { %v473_v28 = vsub.f32 %v471_v24, %v472_v25  ;;  %v475_v29 = vmul.f32 %v474_v26, %v433_v9  ;;  %v476_v30 = vmul.f32 %v474_v26, %v435_v13 }
 0x1a6   :  { %v478_v31 = vperm.slane %v473_v28, 0 }
 0x1a8   :  { %v481_v32 = vadd.f32 %v478_v31, %v476_v30  ;;  %v480_v33 = vadd.f32 %v478_v31, %v475_v29  ;;  %v1051_v31 = vld [vmem:[%s1405_s10 + $0x18] sm:$0xff] }
 0x1a9   :  { %731 = vmatpush.bf16.msrb.mxu1 %v1051_v31 }
 0x1aa   :  { %v958_v34 = vmul.f32 -1.442695, %v481_v32  ;;  %v957_v35 = vmul.f32 -1.442695, %v480_v33 }
 0x1ac   :  { %1077 = vpow2.f32 %v958_v34  ;;  %v638_v34 = vld [vmem:[%s1406_s8] sm:$0x1] }
 0x1ad   :  { %1079 = vpow2.f32 %v957_v35  ;;  %v1050_v35 = vld [vmem:[%s1405_s10 + $0x10] sm:$0xff] }
 0x1ae   :  { %732 = vmatpush.bf16.msrb.mxu1 %v1050_v35 }
 0x1b2   :  { %v1078_v36 = vpop.eup %1077 }
 0x1b3   :  { %v1080_v37 = vpop.eup %1079  ;;  %v489_v38 = vadd.f32 1.0, %v1078_v36 }
 0x1b4   :  { %v488_v39 = vadd.f32 1.0, %v1080_v37 }
 0x1b5   :  { %1081 = vrcp.f32 %v489_v38  ;;  %v516_v48 = vand.u32 2147483648, %v489_v38  ;;  %v514_v13 = vand.u32 2147483647, %v489_v38  ;;  %vm510_vm13 = vweird.f32 %v489_v38 }
 0x1b6   :  { %1083 = vrcp.f32 %v488_v39  ;;  %v501_v9 = vand.u32 2147483648, %v488_v39  ;;  %v499_v49 = vand.u32 2147483647, %v488_v39  ;;  %vm495_vm14 = vweird.f32 %v488_v39 }
 0x1b7   :  { %v517_v52 = vor.u32 1.1754944e-38, %v516_v48  ;;  %vm515_vm1 = vcmp.eq.f32.partialorder %v514_v13, 8.507059e+37  ;;  %v1048_v48 = vld [vmem:[%s1405_s10] sm:$0xff] }
 0x1b8   :  { %v502_v53 = vor.u32 1.1754944e-38, %v501_v9  ;;  %vm500_vm2 = vcmp.eq.f32.partialorder %v499_v49, 8.507059e+37 }
 0x1bb   :  { %v1082_v40 = vpop.eup %1081 }
 0x1bc   :  { %v1084_v41 = vpop.eup %1083  ;;  %v506_v43 = vmul.f32 %v1082_v40, %v489_v38  ;;  %vm511_vm11 = vweird.f32 %v1082_v40  ;;  %v640_v38 = vld [vmem:[%s1407_s9] sm:$0x1] }
 0x1bd   :  { %v491_v44 = vmul.f32 %v1084_v41, %v488_v39  ;;  %vm496_vm12 = vweird.f32 %v1084_v41  ;;  %vm512_vm15 = vmor %vm510_vm13, %vm511_vm11 }
 0x1be   :  { %v507_v42 = vsub.f32 1.0, %v506_v43  ;;  %vm497_vm0 = vmor %vm495_vm14, %vm496_vm12 }
 0x1bf   :  { %v492_v45 = vsub.f32 1.0, %v491_v44 }
 0x1c0   :  { %v508_v7 = vmul.f32 %v1082_v40, %v507_v42 }
 0x1c1   :  { %v493_v8 = vmul.f32 %v1084_v41, %v492_v45 }
 0x1c2   :  { %v509_v50 = vadd.f32 %v1082_v40, %v508_v7 }
 0x1c3   :  { %v494_v51 = vadd.f32 %v1084_v41, %v493_v8 }
 0x1c4   :  { %v513_v54 = vsel %vm512_vm15, %v1082_v40, %v509_v50  ;;  %vm741_vm15 = vcmask 261120  }
 0x1c5   :  { %v498_v55 = vsel %vm497_vm0, %v1084_v41, %v494_v51  ;;  %v518_v46 = vsel %vm515_vm1, %v517_v52, %v513_v54  ;;  %v1049_v41 = vld [vmem:[%s1405_s10 + $0x8] sm:$0xff] }
 0x1c6   :  { %v503_v56 = vsel %vm500_vm2, %v502_v53, %v498_v55  ;;  %v521_v57 = vmul.f32 %v518_v46, %v481_v32  ;;  %733 = vmatpush.bf16.msrb.mxu1 %v1049_v41 }
 0x1c7   :  { %v520_v47 = vmul.f32 %v503_v56, %v480_v33 }
 0x1c9   :  { %v522_v58 = vpack.c.bf16 %v521_v57, %v520_v47 }
 0x1ca   :  { %734 = vmatpush.bf16.msrb.mxu1 %v1048_v48 }
 0x1cb   :  { %595 = vmatmul.bf16.vlgmr.msrb.gmra.mxu0 %v522_v58 }
 0x248   :  { %v596_v59 = vpop.f32.mrf.mxu0 }
 0x249   :  { %v611_v60 = vmul.f32 %v596_v59, %v596_v59  ;;  %v602_v62 = vsel %vm601_vm3, %v596_v59, 0.0 }
 0x24b   :  { %v613_v2 = vsel %vm601_vm3, %v611_v60, 0.0 }
 0x250   :  { %v598_v61 = vpop.f32.mrf.mxu0 }
 0x251   :  { %v603_v63 = vsel %vm601_vm3, %v598_v61, 0.0  ;;  %v612_v0 = vmul.f32 %v598_v61, %v598_v61 }
 0x252   :  { %v604_v1 = vadd.f32 %v603_v63, %v602_v62 }
 0x253   :  { %v614_v3 = vsel %vm601_vm3, %v612_v0, 0.0 }
 0x254   :  { %v605_v4 = vrot.slane %v604_v1, 4  ;;  %v615_v5 = vadd.f32 %v614_v3, %v613_v2 }
 0x256   :  { %v606_v6 = vadd.f32 %v605_v4, %v604_v1  ;;  %v616_v10 = vrot.slane %v615_v5, 4 }
 0x258   :  { %v607_v11 = vrot.slane %v606_v6, 2  ;;  %v617_v12 = vadd.f32 %v616_v10, %v615_v5 }
 0x25a   :  { %v608_v14 = vadd.f32 %v607_v11, %v606_v6  ;;  %v618_v15 = vrot.slane %v617_v12, 2 }
 0x25c   :  { %v609_v16 = vrot.slane %v608_v14, 1  ;;  %v619_v17 = vadd.f32 %v618_v15, %v617_v12 }
 0x25e   :  { %v610_v18 = vadd.f32 %v609_v16, %v608_v14  ;;  %v620_v19 = vrot.slane %v619_v17, 1 }
 0x260   :  { %v621_v20 = vadd.f32 %v620_v19, %v619_v17  ;;  %v622_v21 = vmul.f32 0.0625, %v610_v18 }
 0x262   :  { %v623_v22 = vmul.f32 0.0625, %v621_v20  ;;  %v624_v23 = vmul.f32 %v622_v21, %v622_v21 }
 0x264   :  { %v625_v24 = vsub.f32 %v623_v22, %v624_v23 }
 0x266   :  { %v626_v25 = vmax.f32 %v625_v24, 0.0 }
 0x268   :  { %v627_v26 = vadd.f32 1e-05, %v626_v25 }
 0x26a   :  { %1085 = vrsqrt.f32 %v627_v26  ;;  %vm634_vm5 = vweird.f32 %v627_v26 }
 0x270   :  { %v1086_v27 = vpop.eup %1085 }
 0x271   :  { %v629_v28 = vmul.f32 %v1086_v27, %v627_v26  ;;  %vm635_vm4 = vweird.f32 %v1086_v27 }
 0x272   :  { %vm636_vm6 = vmor %vm634_vm5, %vm635_vm4 }
 0x273   :  { %v630_v29 = vmul.f32 %v1086_v27, %v629_v28 }
 0x275   :  { %v631_v30 = vmul.f32 0.5, %v630_v29 }
 0x277   :  { %v632_v32 = vsub.f32 1.5, %v631_v30 }
 0x279   :  { %v633_v33 = vmul.f32 %v1086_v27, %v632_v32 }
 0x27b   :  { %v637_v36 = vsel %vm636_vm6, %v1086_v27, %v633_v33 }
 0x27c   :  { %v639_v37 = vmul.f32 %v638_v34, %v637_v36 }
 0x27e   :  { %v641_v39 = vmul.f32 %v639_v37, %v622_v21  ;;  %v643_v40 = vperm.slane %v639_v37, 0 }
 0x280   :  { %v642_v43 = vsub.f32 %v640_v38, %v641_v39  ;;  %v644_v44 = vmul.f32 %v643_v40, %v596_v59  ;;  %v645_v42 = vmul.f32 %v643_v40, %v598_v61 }
 0x282   :  { %v647_v45 = vperm.slane %v642_v43, 0 }
 0x284   :  { %v649_v9 = vadd.f32 %v647_v45, %v644_v44  ;;  %v650_v7 = vadd.f32 %v647_v45, %v645_v42 }
 0x286   :  { %v991_v13 = vmul.f32 -1.442695, %v649_v9  ;;  %v992_v8 = vmul.f32 -1.442695, %v650_v7 }
 0x288   :  { %1087 = vpow2.f32 %v991_v13 }
 0x289   :  { %1089 = vpow2.f32 %v992_v8 }
 0x28e   :  { %v1088_v49 = vpop.eup %1087 }
 0x28f   :  { %v1090_v50 = vpop.eup %1089  ;;  %v657_v51 = vadd.f32 1.0, %v1088_v49  ;;  %v780_v49 = vld [vmem:[%s1410_s12] sm:$0x1] }
 0x290   :  { %v658_v52 = vadd.f32 1.0, %v1090_v50 }
 0x291   :  { %1091 = vrcp.f32 %v657_v51  ;;  %v670_v47 = vand.u32 2147483648, %v657_v51  ;;  %v668_v60 = vand.u32 2147483647, %v657_v51  ;;  %vm664_vm9 = vweird.f32 %v657_v51 }
 0x292   :  { %1093 = vrcp.f32 %v658_v52  ;;  %v685_v58 = vand.u32 2147483648, %v658_v52  ;;  %v683_v62 = vand.u32 2147483647, %v658_v52  ;;  %vm679_vm10 = vweird.f32 %v658_v52 }
 0x293   :  { %v671_v1 = vor.u32 1.1754944e-38, %v670_v47  ;;  %vm669_vm13 = vcmp.eq.f32.partialorder %v668_v60, 8.507059e+37 }
 0x294   :  { %v686_v2 = vor.u32 1.1754944e-38, %v685_v58  ;;  %vm684_vm14 = vcmp.eq.f32.partialorder %v683_v62, 8.507059e+37 }
 0x297   :  { %v1092_v53 = vpop.eup %1091 }
 0x298   :  { %v1094_v54 = vpop.eup %1093  ;;  %v660_v55 = vmul.f32 %v1092_v53, %v657_v51  ;;  %vm665_vm7 = vweird.f32 %v1092_v53 }
 0x299   :  { %v675_v46 = vmul.f32 %v1094_v54, %v658_v52  ;;  %vm680_vm8 = vweird.f32 %v1094_v54  ;;  %vm666_vm11 = vmor %vm664_vm9, %vm665_vm7  ;;  %v1053_v52 = vld [vmem:[%s1411_s13 + $0x8] sm:$0xff] }
 0x29a   :  { %v661_v56 = vsub.f32 1.0, %v660_v55  ;;  %vm681_vm12 = vmor %vm679_vm10, %vm680_vm8  ;;  %861 = vmatpush.bf16.msra.mxu1 %v1053_v52 }
 0x29b   :  { %v676_v57 = vsub.f32 1.0, %v675_v46 }
 0x29c   :  { %v662_v59 = vmul.f32 %v1092_v53, %v661_v56  ;;  %v1052_v56 = vld [vmem:[%s1411_s13] sm:$0xff] }
 0x29d   :  { %v677_v61 = vmul.f32 %v1094_v54, %v676_v57 }
 0x29e   :  { %v663_v63 = vadd.f32 %v1092_v53, %v662_v59  ;;  %862 = vmatpush.bf16.msra.mxu1 %v1052_v56 }
 0x29f   :  { %v678_v0 = vadd.f32 %v1094_v54, %v677_v61 }
 0x2a0   :  { %v667_v3 = vsel %vm666_vm11, %v1092_v53, %v663_v63 }
 0x2a1   :  { %v682_v4 = vsel %vm681_vm12, %v1094_v54, %v678_v0  ;;  %v672_v5 = vsel %vm669_vm13, %v671_v1, %v667_v3 }
 0x2a2   :  { %v687_v6 = vsel %vm684_vm14, %v686_v2, %v682_v4  ;;  %v689_v10 = vmul.f32 %v672_v5, %v649_v9 }
 0x2a3   :  { %v690_v11 = vmul.f32 %v687_v6, %v650_v7  ;;  %v778_v7 = vld [vmem:[%s1409_s11] sm:$0x1] }
 0x2a5   :  { %v691_v12 = vpack.c.bf16 %v690_v11, %v689_v10 }
 0x2a7   :  { %1009 = vmatmul.msk.bf16.vlgmr.msrb.gmra.mxu1 %vm601_vm3, %v691_v12 }
 0x324   :  { %v736_v14 = vpop.f32.mrf.mxu1 }
 0x325   :  { %v751_v15 = vmul.f32 %v736_v14, %v736_v14  ;;  %v742_v17 = vsel %vm741_vm15, %v736_v14, 0.0 }
 0x327   :  { %v753_v21 = vsel %vm741_vm15, %v751_v15, 0.0 }
 0x32c   :  { %v738_v16 = vpop.f32.mrf.mxu1 }
 0x32d   :  { %v743_v18 = vsel %vm741_vm15, %v738_v16, 0.0  ;;  %v752_v19 = vmul.f32 %v738_v16, %v738_v16 }
 0x32e   :  { %v744_v20 = vadd.f32 %v743_v18, %v742_v17 }
 0x32f   :  { %v754_v22 = vsel %vm741_vm15, %v752_v19, 0.0 }
 0x330   :  { %v745_v23 = vrot.slane %v744_v20, 4  ;;  %v755_v24 = vadd.f32 %v754_v22, %v753_v21 }
 0x332   :  { %v746_v25 = vadd.f32 %v745_v23, %v744_v20  ;;  %v756_v26 = vrot.slane %v755_v24, 4 }
 0x334   :  { %v747_v27 = vrot.slane %v746_v25, 2  ;;  %v757_v28 = vadd.f32 %v756_v26, %v755_v24 }
 0x336   :  { %v748_v29 = vadd.f32 %v747_v27, %v746_v25  ;;  %v758_v30 = vrot.slane %v757_v28, 2  ;;  %v1054_v27 = vld [vmem:[%s1408_s14] ss:$0 sm:$0xff] }
 0x338   :  { %v749_v31 = vrot.slane %v748_v29, 1  ;;  %v759_v32 = vadd.f32 %v758_v30, %v757_v28 }
 0x33a   :  { %v750_v33 = vadd.f32 %v749_v31, %v748_v29  ;;  %v760_v34 = vrot.slane %v759_v32, 1 }
 0x33c   :  { %v761_v35 = vadd.f32 %v760_v34, %v759_v32  ;;  %v762_v36 = vmul.f32 0.0625, %v750_v33 }
 0x33e   :  { %v763_v37 = vmul.f32 0.0625, %v761_v35  ;;  %v764_v38 = vmul.f32 %v762_v36, %v762_v36 }
 0x340   :  { %v765_v39 = vsub.f32 %v763_v37, %v764_v38 }
 0x342   :  { %v766_v40 = vmax.f32 %v765_v39, 0.0 }
 0x344   :  { %v767_v41 = vadd.f32 1e-05, %v766_v40 }
 0x346   :  { %1095 = vrsqrt.f32 %v767_v41  ;;  %vm774_vm1 = vweird.f32 %v767_v41 }
 0x34c   :  { %v1096_v43 = vpop.eup %1095 }
 0x34d   :  { %v769_v44 = vmul.f32 %v1096_v43, %v767_v41  ;;  %vm775_vm0 = vweird.f32 %v1096_v43 }
 0x34e   :  { %vm776_vm2 = vmor %vm774_vm1, %vm775_vm0 }
 0x34f   :  { %v770_v42 = vmul.f32 %v1096_v43, %v769_v44 }
 0x351   :  { %v771_v45 = vmul.f32 0.5, %v770_v42 }
 0x353   :  { %v772_v48 = vsub.f32 1.5, %v771_v45 }
 0x355   :  { %v773_v9 = vmul.f32 %v1096_v43, %v772_v48 }
 0x357   :  { %v777_v13 = vsel %vm776_vm2, %v1096_v43, %v773_v9 }
 0x358   :  { %v779_v8 = vmul.f32 %v778_v7, %v777_v13 }
 0x35a   :  { %v781_v50 = vmul.f32 %v779_v8, %v762_v36  ;;  %v783_v51 = vperm.slane %v779_v8, 0 }
 0x35c   :  { %v782_v53 = vsub.f32 %v780_v49, %v781_v50  ;;  %v784_v54 = vmul.f32 %v783_v51, %v736_v14  ;;  %v785_v55 = vmul.f32 %v783_v51, %v738_v16 }
 0x35e   :  { %v787_v46 = vperm.slane %v782_v53, 0 }
 0x360   :  { %v789_v57 = vadd.f32 %v787_v46, %v784_v54  ;;  %v790_v47 = vadd.f32 %v787_v46, %v785_v55 }
 0x362   :  { %v1010_v58 = vmul.f32 -1.442695, %v789_v57  ;;  %v1011_v59 = vmul.f32 -1.442695, %v790_v47 }
 0x364   :  { %1097 = vpow2.f32 %v1010_v58 }
 0x365   :  { %1099 = vpow2.f32 %v1011_v59 }
 0x36a   :  { %v1098_v60 = vpop.eup %1097 }
 0x36b   :  { %v1100_v61 = vpop.eup %1099  ;;  %v797_v62 = vadd.f32 1.0, %v1098_v60 }
 0x36c   :  { %v798_v63 = vadd.f32 1.0, %v1100_v61 }
 0x36d   :  { %1101 = vrcp.f32 %v797_v62  ;;  %v810_v5 = vand.u32 2147483648, %v797_v62  ;;  %v808_v11 = vand.u32 2147483647, %v797_v62  ;;  %vm804_vm5 = vweird.f32 %v797_v62 }
 0x36e   :  { %1103 = vrcp.f32 %v798_v63  ;;  %v825_v12 = vand.u32 2147483648, %v798_v63  ;;  %v823_v15 = vand.u32 2147483647, %v798_v63  ;;  %vm819_vm7 = vweird.f32 %v798_v63 }
 0x36f   :  { %v811_v17 = vor.u32 1.1754944e-38, %v810_v5  ;;  %vm809_vm8 = vcmp.eq.f32.partialorder %v808_v11, 8.507059e+37 }
 0x370   :  { %v826_v20 = vor.u32 1.1754944e-38, %v825_v12  ;;  %vm824_vm10 = vcmp.eq.f32.partialorder %v823_v15, 8.507059e+37 }
 0x373   :  { %v1102_v0 = vpop.eup %1101 }
 0x374   :  { %v1104_v1 = vpop.eup %1103  ;;  %v800_v2 = vmul.f32 %v1102_v0, %v797_v62  ;;  %vm805_vm3 = vweird.f32 %v1102_v0 }
 0x375   :  { %v815_v3 = vmul.f32 %v1104_v1, %v798_v63  ;;  %vm820_vm4 = vweird.f32 %v1104_v1  ;;  %vm806_vm6 = vmor %vm804_vm5, %vm805_vm3 }
 0x376   :  { %v801_v4 = vsub.f32 1.0, %v800_v2  ;;  %vm821_vm9 = vmor %vm819_vm7, %vm820_vm4 }
 0x377   :  { %v816_v6 = vsub.f32 1.0, %v815_v3 }
 0x378   :  { %v802_v10 = vmul.f32 %v1102_v0, %v801_v4 }
 0x379   :  { %v817_v14 = vmul.f32 %v1104_v1, %v816_v6 }
 0x37a   :  { %v803_v16 = vadd.f32 %v1102_v0, %v802_v10 }
 0x37b   :  { %v818_v18 = vadd.f32 %v1104_v1, %v817_v14 }
 0x37c   :  { %v807_v19 = vsel %vm806_vm6, %v1102_v0, %v803_v16 }
 0x37d   :  { %v812_v21 = vsel %vm809_vm8, %v811_v17, %v807_v19  ;;  %v822_v22 = vsel %vm821_vm9, %v1104_v1, %v818_v18 }
 0x37e   :  { %v827_v23 = vsel %vm824_vm10, %v826_v20, %v822_v22  ;;  %v829_v24 = vmul.f32 %v812_v21, %v789_v57 }
 0x37f   :  { %v830_v25 = vmul.f32 %v827_v23, %v790_v47 }
 0x381   :  { %v831_v26 = vpack.c.bf16 %v830_v25, %v829_v24 }
 0x383   :  { %1020 = vmatmul.msk.bf16.vlgmr.msra.gmra.mxu1 %vm741_vm15, %v831_v26 }
 0x400   :  { %v864_v28 = vpop.f32.mrf.mxu1 }
 0x401   :  { %v865_v29 = vadd.f32 %v1054_v27, %v864_v28 }
 0x403   :  { %869 = vst [vmem:[%s1412_s15] sm:$0xff] %v865_v29 }
 0x408   :  { %v866_v30 = vpop.f32.mrf.mxu1 }
 0x409   :  { %v867_v31 = vadd.f32 %v1054_v27, %v866_v30 }
 0x40b   :  { %870 = vst [vmem:[%s1412_s15 + $0x8] sm:$0xff] %v867_v31 }

</bundles_post_ra>
